<compile_context>
chip_gen: v6e
topology: v6e:2x2x1
jax: 0.10.0
libtpu: 0.0.40
codegen_flags: <defaults>
</compile_context>

<pallas_src>
import math

import jax
import jax.numpy as jnp
from jax.experimental import pallas as pl
from jax.experimental.pallas import tpu as pltpu


def _round_up(a, b):
    return (a + b - 1) // b * b


# ----------------------------------------------------------------------------- kernels
def _flatten_head_kernel(x_ref, w_ref, b_ref, o_ref):
    # Single K block: o = x @ w + b in one shot. f32 MXU accumulate.
    acc = jnp.dot(x_ref[...], w_ref[...], preferred_element_type=jnp.float32)
    o_ref[...] = (acc + b_ref[...].astype(jnp.float32)).astype(o_ref.dtype)


def _flatten_head_kernel_ksplit(x_ref, w_ref, b_ref, o_ref, acc_ref):
    # nf split across grid axis 2 ("arbitrary", innermost): f32 VMEM accumulator.
    @pl.when(pl.program_id(2) == 0)
    def _():
        acc_ref[...] = jnp.zeros_like(acc_ref)

    acc_ref[...] += jnp.dot(x_ref[...], w_ref[...], preferred_element_type=jnp.float32)

    @pl.when(pl.program_id(2) == pl.num_programs(2) - 1)
    def _():
        o_ref[...] = (acc_ref[...] + b_ref[...].astype(jnp.float32)).astype(o_ref.dtype)


# ----------------------------------------------------------------------------- tiling
_TM_MAX = 1024          # 512-1024 rows hits 85%+ of HBM roofline on streamed tiles
_TN_MAX = 1024          # output columns per tile
_W_BLOCK_MAX = 24 << 20  # keep a resident weight slab at/below ~24 MiB


def _vmem_capacity_bytes():
    try:
        return int(pltpu.get_tpu_info().vmem_capacity_bytes)
    except Exception:
        return 64 << 20   # conservative fallback (v7x-sized VMEM)


def _select_tiling(M, nf, T_pad, xsz, wsz, osz, budget, tk_override=None):
    """Pick (TM, TN, TK, n_i, n_j, n_k) under a VMEM byte budget."""
    M8 = _round_up(max(M, 1), 8)

    # Column tiling: one lane-dense tile when it fits, else a 128-multiple divisor.
    if T_pad <= _TN_MAX:
        TN = T_pad
    else:
        TN = 128
        for cand in range(_TN_MAX, 127, -128):
            if T_pad % cand == 0:
                TN = cand
                break
    n_j = T_pad // TN

    # K tiling: keep the whole [nf, TN] weight slab resident when it fits.
    w_budget = min(budget // 3, _W_BLOCK_MAX)
    TK = nf
    if (tk_override is not None and 0 < tk_override < nf
            and nf % tk_override == 0 and tk_override % 128 == 0):
        TK = tk_override
    elif nf * TN * wsz > w_budget:
        cand_hi = max((w_budget // (TN * wsz)) // 128 * 128, 128)
        for cand in range(cand_hi, 127, -128):
            if nf % cand == 0:
                TK = cand
                break
        # TODO(synk): nf with no small multiple-of-128 divisor falls back to the
        # full-nf weight block; pathologically large such nf may exceed VMEM.
    n_k = nf // TK if TK != nf else 1

    # Row tiling: spend the remaining budget on double-buffered x / out tiles.
    w_bufs = 1 if (n_k == 1 and n_j == 1) else 2
    fixed = w_bufs * TK * TN * wsz + 2 * TN * 4            # weight + bias
    acc_per_row = TN * 4 if n_k > 1 else 0
    per_row = 2 * TK * xsz + 2 * TN * osz + acc_per_row
    rem = max(budget - fixed, per_row * 8)
    TM = max(8, min(_TM_MAX, (rem // per_row) // 8 * 8, M8))
    n_i = pl.cdiv(M, TM)
    return TM, TN, TK, n_i, n_j, n_k


# ----------------------------------------------------------------------------- wrapper
def prepare_flatten_head_params(weight, bias, *, stream_dtype=None):
    """One-time parameter prep (hoisted out of the per-forward path).

    weight: [target_window, nf] (nn.Linear layout), bias: [target_window].
    Returns (w_t, b2d, target_window): w_t is [nf, T_pad] with T padded to a
    multiple of 128 (lane-dense), b2d is [1, T_pad] in f32.
    stream_dtype=jnp.bfloat16 halves weight HBM traffic if precision allows.
    """
    T, nf = weight.shape
    assert bias.shape == (T,)
    T_pad = _round_up(T, 128)
    w_t = weight.T
    b = bias.astype(jnp.float32)
    if T_pad != T:
        w_t = jnp.pad(w_t, ((0, 0), (0, T_pad - T)))
        b = jnp.pad(b, (0, T_pad - T))
    if stream_dtype is not None:
        w_t = w_t.astype(stream_dtype)
    return w_t, b.reshape(1, T_pad), T


def flatten_head_forward(x, w_t, b2d, target_window, *, block_nf=None):
    """x: [B, n_vars, d_model, patch_num] -> [B, n_vars, target_window]."""
    B, n_vars, d_model, patch_num = x.shape
    nf = d_model * patch_num
    nf_w, T_pad = w_t.shape
    assert nf_w == nf, f"weight expects nf={nf_w}, x implies nf={nf}"
    assert b2d.shape == (1, T_pad)
    assert target_window <= T_pad

    M = B * n_vars
    x2d = x.reshape(M, nf)                  # nn.Flatten(start_dim=-2) + batch collapse

    xsz = jnp.dtype(x.dtype).itemsize
    wsz = jnp.dtype(w_t.dtype).itemsize
    osz = xsz                               # output in x's dtype
    cap = _vmem_capacity_bytes()
    budget = (cap * 3) // 4                 # ~75% of physical VMEM per generation

    TM, TN, TK, n_i, n_j, n_k = _select_tiling(
        M, nf, T_pad, xsz, wsz, osz, budget, tk_override=block_nf)

    # Single row tile + wide output: split columns so both v7x TensorCores get
    # work (same HBM traffic; just one extra grid step on single-core chips).
    if n_i == 1 and n_j == 1 and T_pad >= 512 and T_pad % 256 == 0:
        n_j, TN = 2, T_pad // 2

    w_resident = (n_k == 1 and n_j == 1)    # weight block index never changes
    b_resident = (n_j == 1)                 # bias block index never changes

    def _spec(shape, index_map, resident):
        if resident:
            # Resident operand: single-buffer. Double-buffering a block whose
            # index never changes doubles VMEM for zero overlap benefit.
            return pl.BlockSpec(shape, index_map, pipeline_mode=pl.Buffered(1))
        return pl.BlockSpec(shape, index_map)

    in_specs = [
        pl.BlockSpec((TM, TK), lambda i, j, k: (i, k)),        # streamed x row tiles
        _spec((TK, TN), lambda i, j, k: (k, j), w_resident),   # weight
        _spec((1, TN), lambda i, j, k: (0, j), b_resident),    # bias
    ]
    out_spec = pl.BlockSpec((TM, TN), lambda i, j, k: (i, j))

    if n_k == 1:
        kernel, scratch = _flatten_head_kernel, []
    else:
        kernel = _flatten_head_kernel_ksplit
        scratch = [pltpu.VMEM((TM, TN), jnp.float32)]

    # Footprint-complete VMEM accounting -> explicit limit with headroom.
    w_bufs = 1 if w_resident else 2
    b_bufs = 1 if b_resident else 2
    footprint = (2 * TM * TK * xsz               # x, double-buffered
                 + w_bufs * TK * TN * wsz        # weight
                 + b_bufs * TN * 4               # bias (f32)
                 + 2 * TM * TN * osz             # out, double-buffered
                 + (TM * TN * 4 if n_k > 1 else 0))
    vmem_limit = int(min(cap, max(footprint + (8 << 20), 16 << 20)))

    cost = pl.CostEstimate(
        flops=2 * M * nf * T_pad,
        transcendentals=0,
        bytes_accessed=int(M * nf * xsz + nf * T_pad * wsz
                           + T_pad * 4 + M * T_pad * osz),
    )

    out2d = pl.pallas_call(
        kernel,
        out_shape=jax.ShapeDtypeStruct((M, T_pad), x.dtype),
        grid_spec=pltpu.PrefetchScalarGridSpec(
            num_scalar_prefetch=0,
            grid=(n_i, n_j, n_k),
            in_specs=in_specs,
            out_specs=out_spec,
            scratch_shapes=scratch,
        ),
        compiler_params=pltpu.CompilerParams(
            dimension_semantics=("parallel", "parallel", "arbitrary"),
            vmem_limit_bytes=vmem_limit,
        ),
        cost_estimate=cost,
    )(x2d, w_t, b2d)

    out = out2d if T_pad == target_window else out2d[:, :target_window]
    # Dropout(head_dropout=0) == identity.
    return out.reshape(B, n_vars, target_window)


# ----------------------------------------------------------------------------- demo
def _make_linear_params(key, nf, target_window, dtype=jnp.float32):
    # Deterministic nn.Linear-style init: U(-1/sqrt(nf), 1/sqrt(nf)).
    kw, kb = jax.random.split(key)
    bound = 1.0 / math.sqrt(nf)
    weight = jax.random.uniform(kw, (target_window, nf), minval=-bound, maxval=bound, dtype=dtype)
    bias = jax.random.uniform(kb, (target_window,), minval=-bound, maxval=bound, dtype=dtype)
    return weight, bias


if __name__ == "__main__":
    key = jax.random.PRNGKey(0)
    k1, k2, k3, k4, k5, k6 = jax.random.split(key, 6)

    # Case 1: small shapes consistent with TimeLLM's FlattenHead usage.
    B, n_vars, d_model, patch_num, T1 = 2, 4, 16, 8, 32
    nf1 = d_model * patch_num
    x1 = jax.random.normal(k1, (B, n_vars, d_model, patch_num), dtype=jnp.float32)
    w1, b1 = _make_linear_params(k2, nf1, T1)
    w1_t, b1_2d, _ = prepare_flatten_head_params(w1, b1)        # hoisted, once
    fwd1 = jax.jit(lambda x, w, b: flatten_head_forward(x, w, b, T1))
    y1 = jax.block_until_ready(fwd1(x1, w1_t, b1_2d))
    ref1 = x1.reshape(B, n_vars, nf1) @ w1.T + b1
    assert y1.shape == (B, n_vars, T1)
    assert jnp.allclose(y1, ref1, atol=1e-4, rtol=1e-4)

    # Case 2: ragged M (n_vars=7, partial row block) and T not a multiple of 128.
    B2, n_vars2, d_model2, patch_num2, T2 = 2, 7, 16, 12, 96
    nf2 = d_model2 * patch_num2
    x2 = jax.random.normal(k3, (B2, n_vars2, d_model2, patch_num2), dtype=jnp.float32)
    w2, b2 = _make_linear_params(k4, nf2, T2)
    w2_t, b2_2d, _ = prepare_flatten_head_params(w2, b2)
    y2 = jax.block_until_ready(flatten_head_forward(x2, w2_t, b2_2d, T2))
    ref2 = x2.reshape(B2, n_vars2, nf2) @ w2.T + b2
    assert y2.shape == (B2, n_vars2, T2)
    assert jnp.allclose(y2, ref2, atol=1e-4, rtol=1e-4)

    # Case 3: exercises the K-split accumulator path (block_nf=128 -> n_k=2),
    # the column split (T_pad=512 with a single row tile -> n_j=2), and M < 8.
    B3, n_vars3, d_model3, patch_num3, T3 = 1, 3, 32, 8, 500
    nf3 = d_model3 * patch_num3
    x3 = jax.random.normal(k5, (B3, n_vars3, d_model3, patch_num3), dtype=jnp.float32)
    w3, b3 = _make_linear_params(k6, nf3, T3)
    w3_t, b3_2d, _ = prepare_flatten_head_params(w3, b3)
    y3 = jax.block_until_ready(flatten_head_forward(x3, w3_t, b3_2d, T3, block_nf=128))
    ref3 = x3.reshape(B3, n_vars3, nf3) @ w3.T + b3
    assert y3.shape == (B3, n_vars3, T3)
    assert jnp.allclose(y3, ref3, atol=1e-4, rtol=1e-4)

    print("KERNEL_OK")
</pallas_src>

<mosaic_0001>
module attributes {stable_mosaic.version = 11 : i64} {
  func.func @_flatten_head_kernel(%arg0: i32, %arg1: i32, %arg2: i32, %arg3: memref<8x128xf32, #tpu.memory_space<vmem>>, %arg4: memref<128x128xf32, #tpu.memory_space<vmem>>, %arg5: memref<1x128xf32, #tpu.memory_space<vmem>>, %arg6: memref<8x128xf32, #tpu.memory_space<vmem>>) attributes {dimension_semantics = [#tpu.dimension_semantics<parallel>, #tpu.dimension_semantics<parallel>, #tpu.dimension_semantics<arbitrary>], iteration_bounds = array<i64: 1, 1, 1>, scalar_prefetch = 0 : i64, scratch_operands = 0 : i64, tpu.core_type = #tpu.core_type<tc>, window_params = [{transform_indices = @transform_0, window_bounds = array<i64: 8, 128>}, {pipeline_mode = #tpu.pipeline_mode<synchronous>, transform_indices = @transform_1, window_bounds = array<i64: 128, 128>}, {pipeline_mode = #tpu.pipeline_mode<synchronous>, transform_indices = @transform_2, window_bounds = array<i64: 1, 128>}, {transform_indices = @transform_3, window_bounds = array<i64: 8, 128>}]} {
    %c0 = arith.constant 0 : index
    %c0_0 = arith.constant 0 : index
    %0 = vector.load %arg3[%c0, %c0_0] : memref<8x128xf32, #tpu.memory_space<vmem>>, vector<8x128xf32>
    %c0_1 = arith.constant 0 : index
    %c0_2 = arith.constant 0 : index
    %1 = vector.load %arg4[%c0_1, %c0_2] : memref<128x128xf32, #tpu.memory_space<vmem>>, vector<128x128xf32>
    %cst = arith.constant dense<0.000000e+00> : vector<8x128xf32>
    %2 = tpu.matmul %0, %1, %cst {dimension_numbers = #tpu.dot_dimension_numbers<[1], [0], [0], [1], [0, 0, 1, 1], [], []>} : vector<8x128xf32>, vector<128x128xf32>, vector<8x128xf32> -> vector<8x128xf32>
    %c0_3 = arith.constant 0 : index
    %c0_4 = arith.constant 0 : index
    %3 = vector.load %arg5[%c0_3, %c0_4] : memref<1x128xf32, #tpu.memory_space<vmem>>, vector<1x128xf32>
    %4 = vector.broadcast %3 : vector<1x128xf32> to vector<8x128xf32>
    %5 = arith.addf %2, %4 : vector<8x128xf32>
    %c0_5 = arith.constant 0 : index
    %c0_6 = arith.constant 0 : index
    %6 = vector.load %arg6[%c0_5, %c0_6] : memref<8x128xf32, #tpu.memory_space<vmem>>, vector<8x128xf32>
    tpu.vector_store %arg6[%c0_5, %c0_6], %5 {strides = array<i32>} : memref<8x128xf32, #tpu.memory_space<vmem>>, vector<8x128xf32>,
    return
  }
  func.func @transform_0(%arg0: i32, %arg1: i32, %arg2: i32) -> (i32, i32) {
    %c0_i32 = arith.constant 0 : i32
    return %arg0, %arg2 : i32, i32
  }
  func.func @transform_1(%arg0: i32, %arg1: i32, %arg2: i32) -> (i32, i32) {
    %c0_i32 = arith.constant 0 : i32
    return %arg2, %arg1 : i32, i32
  }
  func.func @transform_2(%arg0: i32, %arg1: i32, %arg2: i32) -> (i32, i32) {
    %c0_i32 = arith.constant 0 : i32
    %c0_i32_0 = arith.constant 0 : i32
    return %c0_i32, %arg1 : i32, i32
  }
  func.func @transform_3(%arg0: i32, %arg1: i32, %arg2: i32) -> (i32, i32) {
    %c0_i32 = arith.constant 0 : i32
    return %arg0, %arg1 : i32, i32
  }
}

</mosaic_0001>

<bundles_post_ra>
// kernel: _lambda_.1
= control target key start
LH: loop header
LB: loop body
LE: loop exit
PB: predicated region body
PF: predicated region fallthrough
CT: control target
= control target key end

     0   :  { %v202_v1 = vmov 0.0   ;;  %vm203_vm0 = vmmov 0   ;;  %s282_s0 = inlined_call_operand.vmem [shape: f32[8,128], index: 0, kind: input, shape index: {}]   ;;  %s283_s1 = inlined_call_operand.vmem [shape: f32[128,128], index: 1, kind: input, shape index: {}]   ;;  %s284_s2 = inlined_call_operand.vmem [shape: f32[1,128], index: 2, kind: input, shape index: {}]   ;;  %s285_s3 = inlined_call_operand.hbm [shape: f32[8,128], index: 3, kind: output, shape index: {}]  }
   0x1   :  { %v31_v0 = vld [vmem:[%s283_s1 + $0x78] sm:$0xff]  ;;  %142 = vmatprep.subr.mxu0 %v202_v1  ;;  %v30_v2 = vld [vmem:[%s283_s1 + $0x70] sm:$0xff]  ;;  %174 = vmatprep.mubr.msk.f32.mxu0 %vm203_vm0, %v202_v1  ;;  %v29_v3 = vld [vmem:[%s283_s1 + $0x68] sm:$0xff] }
   0x2   :  { %143 = vmatpush3.msra.mxu0 %v31_v0  ;;  %v28_v4 = vld [vmem:[%s283_s1 + $0x60] sm:$0xff] }
   0x3   :  { %144 = vmatprep.subr.mxu0 %v202_v1 }
   0x4   :  { %145 = vmatpush3.msra.mxu0 %v30_v2 }
   0x5   :  { %146 = vmatprep.subr.mxu0 %v202_v1 }
   0x6   :  { %147 = vmatpush3.msra.mxu0 %v29_v3 }
   0x7   :  { %8 = vsyncpa [#allocation3], 0  ;;  %148 = vmatprep.subr.mxu0 %v202_v1  ;;  %v27_v5 = vld [vmem:[%s283_s1 + $0x58] sm:$0xff]  ;;  %v26_v6 = vld [vmem:[%s283_s1 + $0x50] sm:$0xff]  ;;  %s204_s21 = smov [#allocation2]  }
   0x8   :  { %149 = vmatpush3.msra.mxu0 %v28_v4  ;;  %v25_v7 = vld [vmem:[%s283_s1 + $0x48] sm:$0xff]  ;;  %v24_v8 = vld [vmem:[%s283_s1 + $0x40] sm:$0xff]  ;;  %v23_v9 = vld [vmem:[%s283_s1 + $0x38] sm:$0xff]  ;;  %s116_s22 = sshll.u32 %s204_s21, 4  ;;  %s117_s22 = int_to_ptr.vmem [resolvable:$true] %s116_s22 }
   0x9   :  { %150 = vmatprep.subr.mxu0 %v202_v1  ;;  %v22_v10 = vld [vmem:[%s283_s1 + $0x30] sm:$0xff]  ;;  %v21_v11 = vld [vmem:[%s283_s1 + $0x28] sm:$0xff]  ;;  %v20_v12 = vld [vmem:[%s283_s1 + $0x20] sm:$0xff]  ;;  %p185_p1 = scmp.lt.s32.totalorder %s117_s22, %s117_s22 }
   0xa   :  { %151 = vmatpush3.msra.mxu0 %v27_v5  ;;  %v19_v13 = vld [vmem:[%s283_s1 + $0x18] sm:$0xff]  ;;  %v18_v14 = vld [vmem:[%s283_s1 + $0x10] sm:$0xff]  ;;  %v17_v15 = vld [vmem:[%s283_s1 + $0x8] sm:$0xff] }
   0xb   :  { %152 = vmatprep.subr.mxu0 %v202_v1  ;;  %v16_v16 = vld [vmem:[%s283_s1] sm:$0xff]  ;;  %s180_s1 = scalar_lea.vmem %s117_s22, 128 }
   0xc   :  { %153 = vmatpush3.msra.mxu0 %v26_v6  ;;  %v15_v17 = vld [vmem:[%s282_s0] sm:$0xff]  ;;  %p181_p0 = scmp.ne.s32.totalorder %s117_s22, %s180_s1  ;;  %p186_p2 = scmp.lt.s32.totalorder %s180_s1, %s180_s1 }
   0xd   :  { %154 = vmatprep.subr.mxu0 %v202_v1  ;;  %v124_v18 = vld [vmem:[%s284_s2] ss:$0 sm:$0xff] }
   0xe   :  { %155 = vmatpush3.msra.mxu0 %v25_v7  ;;  %p187_p3 = por %p186_p2, %p185_p1 }
   0xf   :  { %156 = vmatprep.subr.mxu0 %v202_v1 }
  0x10   :  { %157 = vmatpush3.msra.mxu0 %v24_v8  ;;  %p188_p4 = pnand %p187_p3, %p181_p0 }
  0x11   :  { %158 = vmatprep.subr.mxu0 %v202_v1 }
  0x12   :  { %159 = vmatpush3.msra.mxu0 %v23_v9 }
  0x13   :  { %160 = vmatprep.subr.mxu0 %v202_v1 }
  0x14   :  { %161 = vmatpush3.msra.mxu0 %v22_v10 }
  0x15   :  { %162 = vmatprep.subr.mxu0 %v202_v1 }
  0x16   :  { %163 = vmatpush3.msra.mxu0 %v21_v11 }
  0x17   :  { %164 = vmatprep.subr.mxu0 %v202_v1 }
  0x18   :  { %165 = vmatpush3.msra.mxu0 %v20_v12 }
  0x19   :  { %166 = vmatprep.subr.mxu0 %v202_v1 }
  0x1a   :  { %167 = vmatpush3.msra.mxu0 %v19_v13 }
  0x1b   :  { %168 = vmatprep.subr.mxu0 %v202_v1 }
  0x1c   :  { %169 = vmatpush3.msra.mxu0 %v18_v14 }
  0x1d   :  { %170 = vmatprep.subr.mxu0 %v202_v1 }
  0x1e   :  { %171 = vmatpush3.msra.mxu0 %v17_v15 }
  0x1f   :  { %172 = vmatprep.subr.mxu0 %v202_v1 }
  0x20   :  { %173 = vmatpush3.msra.mxu0 %v16_v16 }
  0x21   :  { %175 = vmatmul.mubr.f32.vlgmr.msra.gmra.mxu0 %v15_v17 }
  0xe1   :  { %v105_v19 = vpop.f32.mrf.mxu0 }
  0xe2   :  { %v106_v20 = vadd.f32 %v124_v18, %v105_v19 }
  0xe3   :  { %v176_v21 = vpop.f32.mrf.mxu0 }
  0xe4   :  { %109 = vst [vmem:[#allocation2] sm:$0xff] %v106_v20 }
  0xe5   :  { %191 = shalt.err (!%p188_p4)
}
  0xe6   :  { %119 = dma.vmem_to_hbm [thread:$0]  %s117_s22, 128, %s285_s3, [#allocation3]  }
  0xe7   :  { %200 = dma.done.wait [#allocation3], 128  }
  0xe8   :  { %201 = vsyncadd [#allocation3], 4294967168 }
  0xe9   :  { %123 = vsyncpa [#allocation3], 1 }

</bundles_post_ra>
